<compile_context>
chip_gen: v7x
topology: tpu7x:2x2x1
jax: 0.10.0
libtpu: 0.0.40
codegen_flags: <defaults>
</compile_context>

<pallas_src>
import functools

import jax
import jax.numpy as jnp
import numpy as np
from jax import lax
from jax.experimental import pallas as pl
from jax.experimental.pallas import tpu as pltpu

# ---- model hyper-parameters (small, consistent with the module) ----
B = 2
NUM_WORDS = 32          # num_words
HID = 32                # bow_mid_hid
VAE_MID = 16            # vae_mid
SLAB = 128              # lane-dense consolidated output width: out|mu|var|z|x|pad

# column layout of the consolidated output slab
_OFF_OUT = 0
_OFF_MU = _OFF_OUT + NUM_WORDS        # 32
_OFF_VAR = _OFF_MU + VAE_MID          # 48
_OFF_Z = _OFF_VAR + VAE_MID           # 64
_OFF_X = _OFF_Z + VAE_MID             # 80
_OFF_END = _OFF_X + HID               # 112 (pad 112:128 with zeros)

# is_traing=False -> reparameterize returns mu exactly (no gaussian noise).
# TODO(synk): training-mode reparameterize (eps ~ N(0,1)) would use pltpu.prng_*.


def _static_model_kernel(x_bow_ref,
                         w1_ref, b1_ref, wt_ref, bt_ref,
                         wmuvar_ref, bmuvar_ref,
                         wde_ref, bde_ref,
                         slab_ref):
    f32 = jnp.float32

    def mm(a, b):
        return jnp.dot(a, b, preferred_element_type=f32)

    # ---- BowEncoder: relu(fc1(x_bow)) -> relu(fc_trans(.)) ----
    xb = x_bow_ref[...]                                               # [B, NW]
    h = jnp.maximum(mm(xb, w1_ref[...]) + b1_ref[...], 0.0)           # [B, HID]
    x = jnp.maximum(mm(h, wt_ref[...]) + bt_ref[...], 0.0)            # [B, HID]

    # ---- VAE head: fused mu|var projection (one matmul, slice the result) ----
    muvar = mm(x, wmuvar_ref[...]) + bmuvar_ref[...]                  # [B, 2*VAE_MID]
    mu = muvar[:, :VAE_MID]
    var = muvar[:, VAE_MID:]
    z = mu                                                            # eval path

    # ---- decoder: softmax(z) -> fc_bow_de ----
    zs = z - jnp.max(z, axis=-1, keepdims=True)
    e = jnp.exp(zs)
    inv_den = pl.reciprocal(jnp.sum(e, axis=-1, keepdims=True), approx=True)
    theta = e * inv_den                                               # [B, VAE_MID]
    out = mm(theta, wde_ref[...]) + bde_ref[...]                      # [B, NW]

    # ---- single lane-dense consolidated output store ----
    pad = jnp.zeros((B, SLAB - _OFF_END), f32)
    slab_ref[...] = jnp.concatenate([out, mu, var, z, x, pad], axis=-1)


def static_forward(params, x_bow):
    # glue: fuse mu_line / var_line weights so the kernel does one matmul
    wmuvar = jnp.concatenate([params['wmu'], params['wvar']], axis=1)  # [HID, 2*VM]
    bmuvar = jnp.concatenate([params['bmu'], params['bvar']], axis=1)  # [1, 2*VM]

    inputs = (x_bow.astype(jnp.float32),
              params['w1'], params['b1'], params['wt'], params['bt'],
              wmuvar, bmuvar,
              params['wde'], params['bde'])

    vmem = pl.BlockSpec(memory_space=pltpu.MemorySpace.VMEM)
    slab = pl.pallas_call(
        _static_model_kernel,
        out_shape=jax.ShapeDtypeStruct((B, SLAB), jnp.float32),
        in_specs=[vmem] * len(inputs),
        out_specs=vmem,
    )(*inputs)

    out = slab[:, _OFF_OUT:_OFF_OUT + NUM_WORDS]
    mu = slab[:, _OFF_MU:_OFF_MU + VAE_MID]
    var = slab[:, _OFF_VAR:_OFF_VAR + VAE_MID]
    z = slab[:, _OFF_Z:_OFF_Z + VAE_MID]
    x = slab[:, _OFF_X:_OFF_X + HID]
    return out, mu, var, z, x


def init_params(key):
    ks = jax.random.split(key, 12)

    def kaiming_t(k, fin, fout):   # kaiming_normal_ on [out,in], stored as [in,out]
        return jax.random.normal(k, (fin, fout), dtype=jnp.float32) * np.sqrt(2.0 / fin)

    def lin_w(k, fin, fout):       # default nn.Linear weight init, stored as [in,out]
        b = 1.0 / np.sqrt(fin)
        return jax.random.uniform(k, (fin, fout), minval=-b, maxval=b, dtype=jnp.float32)

    def lin_b(k, fin, fout):
        b = 1.0 / np.sqrt(fin)
        return jax.random.uniform(k, (1, fout), minval=-b, maxval=b, dtype=jnp.float32)

    return dict(
        w1=kaiming_t(ks[0], NUM_WORDS, HID), b1=lin_b(ks[1], NUM_WORDS, HID),
        wt=kaiming_t(ks[2], HID, HID),       bt=lin_b(ks[3], HID, HID),
        wmu=lin_w(ks[4], HID, VAE_MID),      bmu=lin_b(ks[5], HID, VAE_MID),
        wvar=lin_w(ks[6], HID, VAE_MID),     bvar=lin_b(ks[7], HID, VAE_MID),
        wde=kaiming_t(ks[8], VAE_MID, NUM_WORDS), bde=lin_b(ks[9], VAE_MID, NUM_WORDS),
    )


def reference_forward(params, x_bow):
    hp = lax.Precision.HIGHEST
    mm = functools.partial(jnp.matmul, precision=hp)
    h = jax.nn.relu(mm(x_bow, params['w1']) + params['b1'])
    x = jax.nn.relu(mm(h, params['wt']) + params['bt'])
    mu = mm(x, params['wmu']) + params['bmu']
    var = mm(x, params['wvar']) + params['bvar']
    z = mu                                     # is_traing=False -> z = mu
    theta = jax.nn.softmax(z, axis=-1)
    out = mm(theta, params['wde']) + params['bde']
    return out, mu, var, z, x


if __name__ == "__main__":
    key = jax.random.PRNGKey(0)
    kp, kb = jax.random.split(key, 2)
    params = init_params(kp)

    x_bow = jax.random.uniform(kb, (B, NUM_WORDS), dtype=jnp.float32)

    outs = static_forward(params, x_bow)
    outs = jax.block_until_ready(outs)

    refs = reference_forward(params, x_bow)
    for o, r in zip(outs, refs):
        np.testing.assert_allclose(np.asarray(o), np.asarray(r), rtol=2e-2, atol=2e-2)

    print("KERNEL_OK")
</pallas_src>

<mosaic_0001>
module attributes {stable_mosaic.version = 11 : i64} {
  func.func @_static_model_kernel(%arg0: memref<2x32xf32, #tpu.memory_space<vmem>>, %arg1: memref<32x32xf32, #tpu.memory_space<vmem>>, %arg2: memref<1x32xf32, #tpu.memory_space<vmem>>, %arg3: memref<32x32xf32, #tpu.memory_space<vmem>>, %arg4: memref<1x32xf32, #tpu.memory_space<vmem>>, %arg5: memref<32x32xf32, #tpu.memory_space<vmem>>, %arg6: memref<1x32xf32, #tpu.memory_space<vmem>>, %arg7: memref<16x32xf32, #tpu.memory_space<vmem>>, %arg8: memref<1x32xf32, #tpu.memory_space<vmem>>, %arg9: memref<2x128xf32, #tpu.memory_space<vmem>>) attributes {dimension_semantics = [], scalar_prefetch = 0 : i64, scratch_operands = 0 : i64, tpu.core_type = #tpu.core_type<tc>} {
    %c0 = arith.constant 0 : index
    %c0_0 = arith.constant 0 : index
    %0 = vector.load %arg0[%c0, %c0_0] : memref<2x32xf32, #tpu.memory_space<vmem>>, vector<2x32xf32>
    %c0_1 = arith.constant 0 : index
    %c0_2 = arith.constant 0 : index
    %1 = vector.load %arg1[%c0_1, %c0_2] : memref<32x32xf32, #tpu.memory_space<vmem>>, vector<32x32xf32>
    %cst = arith.constant dense<0.000000e+00> : vector<2x32xf32>
    %2 = tpu.matmul %0, %1, %cst {dimension_numbers = #tpu.dot_dimension_numbers<[1], [0], [0], [1], [0, 0, 1, 1], [], []>} : vector<2x32xf32>, vector<32x32xf32>, vector<2x32xf32> -> vector<2x32xf32>
    %c0_3 = arith.constant 0 : index
    %c0_4 = arith.constant 0 : index
    %3 = vector.load %arg2[%c0_3, %c0_4] : memref<1x32xf32, #tpu.memory_space<vmem>>, vector<1x32xf32>
    %4 = vector.broadcast %3 : vector<1x32xf32> to vector<2x32xf32>
    %5 = arith.addf %2, %4 : vector<2x32xf32>
    %cst_5 = arith.constant 0.000000e+00 : f32
    %6 = vector.broadcast %cst_5 : f32 to vector<2x32xf32>
    %7 = arith.maximumf %5, %6 : vector<2x32xf32>
    %c0_6 = arith.constant 0 : index
    %c0_7 = arith.constant 0 : index
    %8 = vector.load %arg3[%c0_6, %c0_7] : memref<32x32xf32, #tpu.memory_space<vmem>>, vector<32x32xf32>
    %cst_8 = arith.constant dense<0.000000e+00> : vector<2x32xf32>
    %9 = tpu.matmul %7, %8, %cst_8 {dimension_numbers = #tpu.dot_dimension_numbers<[1], [0], [0], [1], [0, 0, 1, 1], [], []>} : vector<2x32xf32>, vector<32x32xf32>, vector<2x32xf32> -> vector<2x32xf32>
    %c0_9 = arith.constant 0 : index
    %c0_10 = arith.constant 0 : index
    %10 = vector.load %arg4[%c0_9, %c0_10] : memref<1x32xf32, #tpu.memory_space<vmem>>, vector<1x32xf32>
    %11 = vector.broadcast %10 : vector<1x32xf32> to vector<2x32xf32>
    %12 = arith.addf %9, %11 : vector<2x32xf32>
    %cst_11 = arith.constant 0.000000e+00 : f32
    %13 = vector.broadcast %cst_11 : f32 to vector<2x32xf32>
    %14 = arith.maximumf %12, %13 : vector<2x32xf32>
    %c0_12 = arith.constant 0 : index
    %c0_13 = arith.constant 0 : index
    %15 = vector.load %arg5[%c0_12, %c0_13] : memref<32x32xf32, #tpu.memory_space<vmem>>, vector<32x32xf32>
    %cst_14 = arith.constant dense<0.000000e+00> : vector<2x32xf32>
    %16 = tpu.matmul %14, %15, %cst_14 {dimension_numbers = #tpu.dot_dimension_numbers<[1], [0], [0], [1], [0, 0, 1, 1], [], []>} : vector<2x32xf32>, vector<32x32xf32>, vector<2x32xf32> -> vector<2x32xf32>
    %c0_15 = arith.constant 0 : index
    %c0_16 = arith.constant 0 : index
    %17 = vector.load %arg6[%c0_15, %c0_16] : memref<1x32xf32, #tpu.memory_space<vmem>>, vector<1x32xf32>
    %18 = vector.broadcast %17 : vector<1x32xf32> to vector<2x32xf32>
    %19 = arith.addf %16, %18 : vector<2x32xf32>
    %20 = vector.extract_strided_slice %19 {offsets = [0, 0], sizes = [2, 16], strides = [1, 1]} : vector<2x32xf32> to vector<2x16xf32>
    %21 = vector.extract_strided_slice %19 {offsets = [0, 16], sizes = [2, 16], strides = [1, 1]} : vector<2x32xf32> to vector<2x16xf32>
    %cst_17 = arith.constant dense<0xFF800000> : vector<2xf32>
    %22 = vector.multi_reduction <maximumf>, %20, %cst_17 [1] : vector<2x16xf32> to vector<2xf32>
    %23 = vector.shape_cast %22 : vector<2xf32> to vector<2x1xf32>
    %24 = vector.broadcast %23 : vector<2x1xf32> to vector<2x16xf32>
    %25 = arith.subf %20, %24 : vector<2x16xf32>
    %26 = math.exp %25 : vector<2x16xf32>
    %cst_18 = arith.constant dense<0.000000e+00> : vector<2xf32>
    %27 = vector.multi_reduction <add>, %26, %cst_18 [1] : vector<2x16xf32> to vector<2xf32>
    %28 = vector.shape_cast %27 : vector<2xf32> to vector<2x1xf32>
    %29 = tpu.reciprocal %28 {approx = true} : vector<2x1xf32> -> vector<2x1xf32>
    %30 = vector.broadcast %29 : vector<2x1xf32> to vector<2x16xf32>
    %31 = arith.mulf %26, %30 : vector<2x16xf32>
    %c0_19 = arith.constant 0 : index
    %c0_20 = arith.constant 0 : index
    %32 = vector.load %arg7[%c0_19, %c0_20] : memref<16x32xf32, #tpu.memory_space<vmem>>, vector<16x32xf32>
    %cst_21 = arith.constant dense<0.000000e+00> : vector<2x32xf32>
    %33 = tpu.matmul %31, %32, %cst_21 {dimension_numbers = #tpu.dot_dimension_numbers<[1], [0], [0], [1], [0, 0, 1, 1], [], []>} : vector<2x16xf32>, vector<16x32xf32>, vector<2x32xf32> -> vector<2x32xf32>
    %c0_22 = arith.constant 0 : index
    %c0_23 = arith.constant 0 : index
    %34 = vector.load %arg8[%c0_22, %c0_23] : memref<1x32xf32, #tpu.memory_space<vmem>>, vector<1x32xf32>
    %35 = vector.broadcast %34 : vector<1x32xf32> to vector<2x32xf32>
    %36 = arith.addf %33, %35 : vector<2x32xf32>
    %cst_24 = arith.constant 0.000000e+00 : f32
    %37 = vector.broadcast %cst_24 : f32 to vector<2x16xf32>
    %38 = tpu.concatenate %36, %20, %21, %20, %14, %37 in 1 : vector<2x32xf32>, vector<2x16xf32>, vector<2x16xf32>, vector<2x16xf32>, vector<2x32xf32>, vector<2x16xf32> -> vector<2x128xf32>
    %c0_25 = arith.constant 0 : index
    %c0_26 = arith.constant 0 : index
    %39 = vector.load %arg9[%c0_25, %c0_26] : memref<2x128xf32, #tpu.memory_space<vmem>>, vector<2x128xf32>
    tpu.vector_store %arg9[%c0_25, %c0_26], %38 {strides = array<i32>} : memref<2x128xf32, #tpu.memory_space<vmem>>, vector<2x128xf32>,
    return
  }
}

</mosaic_0001>

<bundles_post_ra>
// kernel: tpu_custom_call.1
= control target key start
LH: loop header
LB: loop body
LE: loop exit
PB: predicated region body
PF: predicated region fallthrough
CT: control target
= control target key end

     0   :  { %14 = vsyncpa [#allocation3], 0  ;;  %s854_s0 = inlined_call_operand.hbm [shape: f32[2,32], index: 0, kind: input, shape index: {}]   ;;  %s855_s1 = inlined_call_operand.hbm [shape: f32[32,32], index: 1, kind: input, shape index: {}]   ;;  %s856_s2 = inlined_call_operand.vmem [shape: f32[1,32], index: 2, kind: input, shape index: {}]   ;;  %s857_s3 = inlined_call_operand.hbm [shape: f32[32,32], index: 3, kind: input, shape index: {}]   ;;  %s858_s4 = inlined_call_operand.vmem [shape: f32[1,32], index: 4, kind: input, shape index: {}]   ;;  %s859_s5 = inlined_call_operand.hbm [shape: f32[32,32], index: 5, kind: input, shape index: {}]   ;;  %s860_s6 = inlined_call_operand.vmem [shape: f32[1,32], index: 6, kind: input, shape index: {}]   ;;  %s861_s7 = inlined_call_operand.vmem [shape: f32[16,32], index: 7, kind: input, shape index: {}]   ;;  %s862_s8 = inlined_call_operand.vmem [shape: f32[1,32], index: 8, kind: input, shape index: {}]   ;;  %s863_s9 = inlined_call_operand.hbm [shape: f32[2,128], index: 9, kind: output, shape index: {}]  }
   0x1   :  { %15 = vsyncpa [#allocation6], 0 }
   0x2   :  { %16 = vsyncpa [#allocation9], 0 }
   0x3   :  { %17 = vsyncpa [#allocation4], 0  ;;  %s696_s30 = smov [#allocation5]   ;;  %s578_s13 = scalar_lea.hbm %s855_s1, 512 }
   0x4   :  { %s33_s10 = sshll.u32 %s696_s30, 4  ;;  %p579_p0 = scmp.ne.s32.totalorder %s855_s1, %s578_s13  ;;  %s34_s10 = int_to_ptr.vmem [resolvable:$true] %s33_s10 }
   0x5   :  { %p582_p1 = scmp.lt.u32.totalorder %s578_s13, %s855_s1 }
   0x7   :  { %p584_p2 = pnand %p582_p1, %p579_p0 }
   0x9   :  { %587 = shalt.err (!%p584_p2)
}
   0xa   :  { %s588_s18 = scalar_lea.vmem %s34_s10, 512  ;;  %p593_p4 = scmp.lt.s32.totalorder %s34_s10, %s34_s10 }
   0xb   :  { %p589_p3 = scmp.ne.s32.totalorder %s34_s10, %s588_s18  ;;  %p594_p5 = scmp.lt.s32.totalorder %s588_s18, %s588_s18 }
   0xd   :  { %p595_p6 = por %p594_p5, %p593_p4 }
   0xf   :  { %p596_p7 = pnand %p595_p6, %p589_p3 }
  0x11   :  { %599 = shalt.err (!%p596_p7)
}
  0x12   :  { %s697_s19 = smov 128   ;;  %s698_s20 = smov 8  }
  0x13   :  { %39 = dma.hbm_to_vmem [thread:$0]  %s855_s1, 512, %s34_s10, [#allocation6], %s697_s19, %s697_s19, %s698_s20  }
  0x14   :  { %s699_s23 = smov [#allocation2]   ;;  %s700_s25 = smov [#allocation7]  }
  0x15   :  { %s24_s24 = sshll.u32 %s699_s23, 4  ;;  %s47_s26 = sshll.u32 %s700_s25, 4  ;;  %s25_s24 = int_to_ptr.vmem [resolvable:$true] %s24_s24  ;;  %s48_s26 = int_to_ptr.vmem [resolvable:$true] %s47_s26 }
  0x16   :  { %s600_s29 = scalar_lea.hbm %s854_s0, 32 }
  0x17   :  { %p601_p8 = scmp.ne.s32.totalorder %s854_s0, %s600_s29  ;;  %p604_p9 = scmp.lt.u32.totalorder %s600_s29, %s854_s0 }
  0x19   :  { %p606_p10 = pnand %p604_p9, %p601_p8 }
  0x1b   :  { %609 = shalt.err (!%p606_p10)
}
  0x1c   :  { %s610_s1 = scalar_lea.vmem %s25_s24, 32  ;;  %p615_p12 = scmp.lt.s32.totalorder %s25_s24, %s25_s24 }
  0x1d   :  { %p611_p11 = scmp.ne.s32.totalorder %s25_s24, %s610_s1  ;;  %p616_p13 = scmp.lt.s32.totalorder %s610_s1, %s610_s1 }
  0x1f   :  { %p617_p0 = por %p616_p13, %p615_p12 }
  0x21   :  { %p618_p1 = pnand %p617_p0, %p611_p11 }
  0x23   :  { %621 = shalt.err (!%p618_p1)
}
  0x24   :  { %27 = dma.hbm_to_vmem [thread:$0]  %s854_s0, 32, %s25_s24, [#allocation3]  }
  0x25   :  { %s622_s17 = scalar_lea.hbm %s857_s3, 512 }
  0x26   :  { %p623_p2 = scmp.ne.s32.totalorder %s857_s3, %s622_s17  ;;  %p626_p3 = scmp.lt.u32.totalorder %s622_s17, %s857_s3 }
  0x28   :  { %p628_p4 = pnand %p626_p3, %p623_p2 }
  0x2a   :  { %631 = shalt.err (!%p628_p4)
}
  0x2b   :  { %s632_s25 = scalar_lea.vmem %s48_s26, 512  ;;  %p637_p6 = scmp.lt.s32.totalorder %s48_s26, %s48_s26 }
  0x2c   :  { %p633_p5 = scmp.ne.s32.totalorder %s48_s26, %s632_s25  ;;  %p638_p7 = scmp.lt.s32.totalorder %s632_s25, %s632_s25 }
  0x2e   :  { %p639_p8 = por %p638_p7, %p637_p6 }
  0x30   :  { %p640_p9 = pnand %p639_p8, %p633_p5 }
  0x32   :  { %643 = shalt.err (!%p640_p9)
}
  0x33   :  { %53 = dma.hbm_to_vmem [thread:$0]  %s857_s3, 512, %s48_s26, [#allocation6], %s697_s19, %s697_s19, %s698_s20  }
  0x34   :  { %s701_s27 = smov [#allocation8]   ;;  %s644_s11 = scalar_lea.hbm %s859_s5, 512 }
  0x35   :  { %s61_s28 = sshll.u32 %s701_s27, 4  ;;  %p645_p10 = scmp.ne.s32.totalorder %s859_s5, %s644_s11  ;;  %s62_s28 = int_to_ptr.vmem [resolvable:$true] %s61_s28 }
  0x36   :  { %p648_p11 = scmp.lt.u32.totalorder %s644_s11, %s859_s5 }
  0x38   :  { %p650_p12 = pnand %p648_p11, %p645_p10 }
  0x3a   :  { %653 = shalt.err (!%p650_p12)
}
  0x3b   :  { %s654_s14 = scalar_lea.vmem %s62_s28, 512  ;;  %p659_p0 = scmp.lt.s32.totalorder %s62_s28, %s62_s28 }
  0x3c   :  { %p655_p13 = scmp.ne.s32.totalorder %s62_s28, %s654_s14  ;;  %p660_p1 = scmp.lt.s32.totalorder %s654_s14, %s654_s14 }
  0x3e   :  { %p661_p2 = por %p660_p1, %p659_p0 }
  0x40   :  { %p662_p3 = pnand %p661_p2, %p655_p13 }
  0x42   :  { %665 = shalt.err (!%p662_p3)
}
  0x43   :  { %67 = dma.hbm_to_vmem [thread:$0]  %s859_s5, 512, %s62_s28, [#allocation9], %s697_s19, %s697_s19, %s698_s20  }
  0x44   :  { %688 = dma.done.wait [#allocation3], 32  }
  0x45   :  { %689 = vsyncadd [#allocation3], 4294967264 }
  0x46   :  { %690 = dma.done.wait [#allocation6], 1024  }
  0x47   :  { %691 = vsyncadd [#allocation6], 4294966272 }
  0x48   :  { %692 = dma.done.wait [#allocation9], 512  }
  0x49   :  { %693 = vsyncadd [#allocation9], 4294966784  ;;  %v702_v0 = vmov 0.0|0.0   ;;  %vm703_vm0 = vmmov 0   ;;  %v704_v1 = vmov 0.0   ;;  %v87_v2 = vld [vmem:[#allocation5] sm:$0xff] }
  0x4a   :  { %540 = vmatprep.subr.bf16.mxu0 %v702_v0  ;;  %508 = vmatprep.mubr.msk.f32.mxu0 %vm703_vm0, %v704_v1  ;;  %v88_v3 = vld [vmem:[#allocation5 + $0x8] sm:$0xff]  ;;  %v89_v4 = vld [vmem:[#allocation5 + $0x10] sm:$0xff]  ;;  %v90_v6 = vld [vmem:[#allocation5 + $0x18] sm:$0xff]  ;;  %vm98_vm1 = vcmask 261120   ;;  %vm342_vm2 = vcmask 123904   ;;  %s705_s17 = smov 32  }
  0x4b   :  { %546 = vmatprep.subr.bf16.mxu1 %v702_v0  ;;  %519 = vmatprep.mubr.msk.f32.mxu1 %vm703_vm0, %v704_v1  ;;  %v541_v5 = vpack.c.bf16 %v88_v3, %v87_v2  ;;  %v173_v7 = vld [vmem:[#allocation7] sm:$0xff]  ;;  %v174_v8 = vld [vmem:[#allocation7 + $0x8] sm:$0xff]  ;;  %v544_v9 = vpack.c.bf16 %v90_v6, %v89_v4  ;;  %v86_v11 = vld [vmem:[#allocation2] sm:$0x3]  ;;  %s706_s18 = smov 64   ;;  %s707_s23 = smov 80  }
  0x4c   :  { %v547_v10 = vpack.c.bf16 %v174_v8, %v173_v7  ;;  %v175_v12 = vld [vmem:[#allocation7 + $0x10] sm:$0xff]  ;;  %v176_v13 = vld [vmem:[#allocation7 + $0x18] sm:$0xff]  ;;  %v258_v15 = vld [vmem:[#allocation8] sm:$0xff]  ;;  %vm363_vm3 = vcmask 130048   ;;  %vm448_vm4 = vcmask 392192   ;;  %vm450_vm5 = vcmask 523264  }
  0x4d   :  { %542 = vmatpush3.bf16.msra.mxu0 %v541_v5  ;;  %v550_v14 = vpack.c.bf16 %v176_v13, %v175_v12  ;;  %v259_v16 = vld [vmem:[#allocation8 + $0x8] sm:$0xff]  ;;  %v260_v23 = vld [vmem:[#allocation8 + $0x10] sm:$0xff]  ;;  %v261_v24 = vld [vmem:[#allocation8 + $0x18] sm:$0xff]  ;;  %vm452_vm6 = vcmask 654336   ;;  %vm454_vm7 = vcmask 916480  }
  0x4e   :  { %543 = vmatprep.subr.bf16.mxu0 %v702_v0  ;;  %548 = vmatpush3.bf16.msra.mxu1 %v547_v10  ;;  %v553_v17 = vpack.c.bf16 %v259_v16, %v258_v15  ;;  %v474_v18 = vld [vmem:[%s856_s2] ss:$0 sm:$0xff]  ;;  %v556_v25 = vpack.c.bf16 %v261_v24, %v260_v23  ;;  %v355_v42 = vld [vmem:[%s861_s7 + $0x8] sm:$0xff] }
  0x4f   :  { %549 = vmatprep.subr.bf16.mxu1 %v702_v0  ;;  %v476_v26 = vld [vmem:[%s858_s4] ss:$0 sm:$0xff] }
  0x50   :  { %v478_v31 = vld [vmem:[%s860_s6] ss:$0 sm:$0xff] }
  0x51   :  { %545 = vmatpush3.bf16.msra.mxu0 %v544_v9  ;;  %v354_v41 = vld [vmem:[%s861_s7] sm:$0xff]  ;;  %s708_s7 = smov [#allocation10]  }
  0x52   :  { %552 = vmatprep.subr.bf16.mxu0 %v702_v0  ;;  %551 = vmatpush3.bf16.msra.mxu1 %v550_v14  ;;  %v559_v43 = vpack.c.bf16 %v355_v42, %v354_v41  ;;  %v480_v48 = vld [vmem:[%s862_s8] ss:$0 sm:$0xff]  ;;  %s463_s24 = sshll.u32 %s708_s7, 4  ;;  %s464_s24 = int_to_ptr.vmem [resolvable:$true] %s463_s24 }
  0x53   :  { %558 = vmatprep.subr.bf16.mxu1 %v702_v0  ;;  %s666_s8 = scalar_lea.vmem %s464_s24, 32  ;;  %p671_p5 = scmp.lt.s32.totalorder %s464_s24, %s464_s24 }
  0x54   :  { %509 = vmatmul.mubr.msk.f32.vlgmr.msra.gmra.mrb[0].mxu0 %vm98_vm1, %v86_v11  ;;  %p667_p4 = scmp.ne.s32.totalorder %s464_s24, %s666_s8  ;;  %p672_p6 = scmp.lt.s32.totalorder %s666_s8, %s666_s8 }
  0x55   :  { %530 = vmatprep.mubr.msk.f32.mxu0 %vm703_vm0, %v704_v1  ;;  %554 = vmatpush3.bf16.msra.mxu0 %v553_v17 }
  0x56   :  { %555 = vmatprep.subr.bf16.mxu0 %v702_v0  ;;  %p673_p7 = por %p672_p6, %p671_p5 }
  0x58   :  { %p674_p8 = pnand %p673_p7, %p667_p4 }
  0x59   :  { %557 = vmatpush3.bf16.msra.mxu0 %v556_v25 }
 0x127   :  { %v168_v19 = vpop.f32.mrb[0].mxu0 }
 0x128   :  { %v169_v20 = vadd.f32 %v474_v18, %v168_v19  ;;  %v510_v21 = vpop.f32.mrb[1].mxu0 }
 0x12a   :  { %v172_v22 = vmax.f32 %v169_v20, 0.0 }
 0x12c   :  { %520 = vmatmul.mubr.msk.f32.vlgmr.msra.gmra.mrb[0].mxu1 %vm98_vm1, %v172_v22 }
 0x12d   :  { %537 = vmatprep.mubr.msk.f32.mxu1 %vm703_vm0, %v704_v1  ;;  %560 = vmatpush3.bf16.msra.mxu1 %v559_v43 }
 0x1ff   :  { %v253_v27 = vpop.f32.mrb[0].mxu1 }
 0x200   :  { %v254_v28 = vadd.f32 %v476_v26, %v253_v27  ;;  %v521_v29 = vpop.f32.mrb[1].mxu1 }
 0x202   :  { %v257_v30 = vmax.f32 %v254_v28, 0.0 }
 0x204   :  { %531 = vmatmul.mubr.msk.f32.vlgmr.msra.gmra.mrb[2].mxu0 %vm98_vm1, %v257_v30 }
 0x2d7   :  { %v338_v32 = vpop.f32.mrb[2].mxu0 }
 0x2d8   :  { %v339_v33 = vadd.f32 %v478_v31, %v338_v32  ;;  %v532_v34 = vpop.f32.mrb[3].mxu0 }
 0x2da   :  { %438 = vrot.lane.b32.xlu1 %v339_v33, %s705_s17  ;;  %v343_v35 = vsel %vm342_vm2, %v339_v33, -inf }
 0x2db   :  { %344 = vmax.xlane.f32.xlu0 %v343_v35 }
 0x2de   :  { %441 = vrot.lane.b32.xlu1 %v339_v33, %s706_s18 }
 0x34c   :  { %v439_v47 = vpop.permute.xlu1 %438 }
 0x350   :  { %v442_v53 = vpop.permute.xlu1 %441 }
 0x368   :  { %v345_v36 = vpop.xlane.xlu0 %344 }
 0x369   :  { %v346_v37 = vsub.f32 %v339_v33, %v345_v36 }
 0x36b   :  { %v347_v38 = vmul.f32 1.442695, %v346_v37 }
 0x36d   :  { %574 = vpow2.f32 %v347_v38 }
 0x377   :  { %v575_v39 = vpop.eup %574 }
 0x378   :  { %v349_v40 = vsel %vm342_vm2, %v575_v39, 0.0 }
 0x379   :  { %350 = vadd.xlane.f32.xlu0 %v349_v40 }
 0x38f   :  { %444 = vrot.lane.b32.xlu0 %v257_v30, %s707_s23 }
 0x406   :  { %v351_v44 = vpop.xlane.xlu0 %350 }
 0x407   :  { %576 = vrcp.f32 %v351_v44 }
 0x40a   :  { %v445_v55 = vpop.permute.xlu0 %444 }
 0x411   :  { %v577_v45 = vpop.eup %576 }
 0x412   :  { %v353_v46 = vmul.f32 %v577_v45, %v575_v39 }
 0x414   :  { %538 = vmatmul.mubr.msk.f32.vlgmr.msra.gmra.mrb[2].mxu1 %vm363_vm3, %v353_v46 }
 0x4e7   :  { %v433_v49 = vpop.f32.mrb[2].mxu1 }
 0x4e8   :  { %v434_v50 = vadd.f32 %v480_v48, %v433_v49  ;;  %v539_v51 = vpop.f32.mrb[3].mxu1 }
 0x4ea   :  { %v447_v52 = vsel %vm98_vm1, %v434_v50, %v439_v47 }
 0x4eb   :  { %v449_v54 = vsel %vm448_vm4, %v447_v52, %v439_v47 }
 0x4ec   :  { %v451_v56 = vsel %vm450_vm5, %v449_v54, %v442_v53 }
 0x4ed   :  { %v453_v57 = vsel %vm452_vm6, %v451_v56, %v445_v55 }
 0x4ee   :  { %v455_v58 = vsel %vm454_vm7, %v453_v57, 0.0 }
 0x4ef   :  { %456 = vst [vmem:[#allocation10] sm:$0x3] %v455_v58 }
 0x4f0   :  { %677 = shalt.err (!%p674_p8)
}
 0x4f1   :  { %s678_s29 = scalar_lea.hbm %s863_s9, 32 }
 0x4f2   :  { %p679_p9 = scmp.ne.s32.totalorder %s863_s9, %s678_s29  ;;  %p682_p10 = scmp.lt.u32.totalorder %s678_s29, %s863_s9 }
 0x4f4   :  { %p684_p11 = pnand %p682_p10, %p679_p9 }
 0x4f6   :  { %687 = shalt.err (!%p684_p11)
}
 0x4f7   :  { %466 = dma.vmem_to_hbm [thread:$0]  %s464_s24, 32, %s863_s9, [#allocation4]  }
 0x4f8   :  { %694 = dma.done.wait [#allocation4], 32  }
 0x4f9   :  { %695 = vsyncadd [#allocation4], 4294967264 }
 0x4fa   :  { %470 = vsyncpa [#allocation3], 1 }
 0x4fb   :  { %471 = vsyncpa [#allocation6], 1 }
 0x4fc   :  { %472 = vsyncpa [#allocation9], 1 }
 0x4fd   :  { %473 = vsyncpa [#allocation4], 1 }

</bundles_post_ra>
